<compile_context>
chip_gen: v7x
topology: tpu7x:2x2x1
jax: 0.10.0
libtpu: 0.0.40
codegen_flags: <defaults>
</compile_context>

<pallas_src>
import math

import jax
import jax.numpy as jnp
from jax import lax
from jax.experimental import pallas as pl
from jax.experimental.pallas import tpu as pltpu

_BF16 = jnp.bfloat16
_F32 = jnp.float32


# ---------------------------------------------------------------------------
# Kernel 1: fused Q/K/V projection into head-split layout (B, h, S, d_k).
# ---------------------------------------------------------------------------
def _qkv_proj_kernel(xq_ref, xk_ref, xv_ref,
                     wq_ref, bq_ref, wk_ref, bk_ref, wv_ref, bv_ref,
                     qo_ref, ko_ref, vo_ref):
    """Grid = (batch, seq_tile, head); head is the innermost axis.

    Blocks seen by the kernel:
      x*_ref : (1, ts, D)      bf16  (block index constant across the head axis
                                      -> Pallas DMAs it once per (b, seq_tile))
      w*_ref : (h, D, d_k)     bf16  (constant index_map -> resident all call)
      b*_ref : (h, 1, d_k)     f32
      *o_ref : (1, 1, ts, d_k) bf16
    """
    hi = pl.program_id(2)

    def _proj(x_ref, w_ref, b_ref, o_ref):
        y = lax.dot_general(x_ref[0], w_ref[hi], (((1,), (0,)), ((), ())),
                            preferred_element_type=_F32) + b_ref[hi]
        o_ref[0, 0] = y.astype(o_ref.dtype)

    _proj(xq_ref, wq_ref, bq_ref, qo_ref)
    _proj(xk_ref, wk_ref, bk_ref, ko_ref)
    _proj(xv_ref, wv_ref, bv_ref, vo_ref)


def _qkv_projection(query, key, value,
                    wq_r, bq_r, wk_r, bk_r, wv_r, bv_r, *, block_s):
    B, S, D = query.shape
    h, _, d_k = wq_r.shape
    n_s = S // block_s

    x_spec = pl.BlockSpec((1, block_s, D), lambda b, si, hi: (b, si, 0))
    w_spec = pl.BlockSpec((h, D, d_k), lambda b, si, hi: (0, 0, 0))
    b_spec = pl.BlockSpec((h, 1, d_k), lambda b, si, hi: (0, 0, 0))
    o_spec = pl.BlockSpec((1, 1, block_s, d_k), lambda b, si, hi: (b, hi, si, 0))
    o_shape = jax.ShapeDtypeStruct((B, h, S, d_k), _BF16)

    return pl.pallas_call(
        _qkv_proj_kernel,
        out_shape=(o_shape, o_shape, o_shape),
        grid=(B, n_s, h),
        in_specs=[x_spec, x_spec, x_spec,
                  w_spec, b_spec, w_spec, b_spec, w_spec, b_spec],
        out_specs=(o_spec, o_spec, o_spec),
        compiler_params=pltpu.CompilerParams(
            dimension_semantics=("parallel", "parallel", "arbitrary"),
            vmem_limit_bytes=32 * 1024 * 1024),
    )(query, key, value, wq_r, bq_r, wk_r, bk_r, wv_r, bv_r)


# ---------------------------------------------------------------------------
# Kernel 2: flash attention (online softmax) + fused output projection.
# ---------------------------------------------------------------------------
def _flash_attn_kernel(q_ref, k_ref, v_ref, wo_ref, bo_ref, o_ref,
                       m_s, l_s, acc_s, out_s):
    """Grid = (batch, q_tile, head, kv_tile); head and kv_tile are reductions.

    Blocks seen by the kernel:
      q_ref  : (1, 1, tq,  d_k) bf16 (pre-scaled by 1/sqrt(d_k); constant over kv)
      k_ref  : (1, 1, tkv, d_k) bf16
      v_ref  : (1, 1, tkv, d_k) bf16
      wo_ref : (1, d_k, D)      bf16 (pre-transposed, current head)
      bo_ref : (1, D)           f32
      o_ref  : (1, tq, D)       out_dtype
    Scratch:
      m_s/l_s (tq, 1) f32 : online-softmax running max / denominator
      acc_s (tq, d_k) f32 : online-softmax running numerator
      out_s (tq, D)   f32 : output-projection accumulator over heads
    """
    hi = pl.program_id(2)
    ki = pl.program_id(3)
    n_h = pl.num_programs(2)
    n_kv = pl.num_programs(3)

    # Fresh output accumulator for every (batch, q_tile).
    @pl.when(jnp.logical_and(hi == 0, ki == 0))
    def _():
        out_s[...] = jnp.zeros_like(out_s)

    # Per-head init of the online-softmax state.
    @pl.when(ki == 0)
    def _():
        m_s[...] = jnp.full_like(m_s, -jnp.inf)
        l_s[...] = jnp.zeros_like(l_s)
        acc_s[...] = jnp.zeros_like(acc_s)

    q = q_ref[0, 0]                                    # (tq,  d_k) bf16
    k = k_ref[0, 0]                                    # (tkv, d_k) bf16
    v = v_ref[0, 0]                                    # (tkv, d_k) bf16

    # Scores: contract the d_k dims directly (no transpose); scale is already
    # folded into the Q projection.
    s = lax.dot_general(q, k, (((1,), (1,)), ((), ())),
                        preferred_element_type=_F32)   # (tq, tkv) f32

    # Online softmax; exp stays f32 (valid on v5e too), result cast to bf16
    # immediately to keep vreg pressure low and feed the MXU in bf16.
    m_prev = m_s[...]
    m_new = jnp.maximum(m_prev, jnp.max(s, axis=-1, keepdims=True))
    alpha = jnp.exp(m_prev - m_new)
    p = jnp.exp(s - m_new).astype(_BF16)               # (tq, tkv) bf16
    l_s[...] = alpha * l_s[...] + jnp.sum(p.astype(_F32), axis=-1, keepdims=True)
    acc_s[...] = alpha * acc_s[...] + lax.dot_general(
        p, v, (((1,), (0,)), ((), ())), preferred_element_type=_F32)
    m_s[...] = m_new

    # End of this head's KV sweep: fold the head into the output projection.
    @pl.when(ki == n_kv - 1)
    def _():
        head_out = acc_s[...] * pl.reciprocal(l_s[...], approx=True)   # (tq, d_k)
        out_s[...] += lax.dot_general(head_out.astype(_BF16), wo_ref[0],
                                      (((1,), (0,)), ((), ())),
                                      preferred_element_type=_F32)

        @pl.when(hi == n_h - 1)
        def _():
            o_ref[0] = (out_s[...] + bo_ref[...]).astype(o_ref.dtype)


# ---------------------------------------------------------------------------
# Wrappers
# ---------------------------------------------------------------------------
def prepare_params(params, *, h):
    """One-time weight re-layout. Do this once per parameter set, not per call.

    nn.Linear stores W as (out, in); the kernels want head-split (in, out)
    blocks.  The 1/sqrt(d_k) attention scale is folded into the Q projection.
    """
    wq, bq, wk, bk, wv, bv, wo, bo = params
    D = wq.shape[0]
    assert D % h == 0
    d_k = D // h
    scale = 1.0 / math.sqrt(d_k)

    def _in_proj(w, s=1.0):                 # (D_out, D_in) -> (h, D_in, d_k)
        return (w.T.reshape(D, h, d_k).transpose(1, 0, 2) * s).astype(_BF16)

    wq_r = _in_proj(wq, scale)
    wk_r = _in_proj(wk)
    wv_r = _in_proj(wv)
    wo_r = wo.T.reshape(h, d_k, D).astype(_BF16)        # (h, d_k, D_out)
    bq_r = (bq * scale).reshape(h, 1, d_k).astype(_F32)
    bk_r = bk.reshape(h, 1, d_k).astype(_F32)
    bv_r = bv.reshape(h, 1, d_k).astype(_F32)
    bo_r = bo.reshape(1, D).astype(_F32)
    return (wq_r, bq_r, wk_r, bk_r, wv_r, bv_r, wo_r, bo_r)


def mha_forward(query, key, value, prepared, *, h,
                block_q=None, block_kv=None, out_dtype=None):
    """query/key/value: (B, S, d_model).  Returns torch.squeeze-ed output."""
    B, S, D = query.shape
    assert D % h == 0
    d_k = D // h
    wq_r, bq_r, wk_r, bk_r, wv_r, bv_r, wo_r, bo_r = prepared
    if out_dtype is None:
        out_dtype = query.dtype     # pass jnp.bfloat16 to halve HBM writeback

    def _pick(pref):
        for t in (pref, 128):
            if S % t == 0:
                return t
        return S

    if block_q is None:
        block_q = _pick(128)
    if block_kv is None:
        block_kv = _pick(256)       # 256-deep kv tiles fill the v6e/v7x MXU
    assert S % block_q == 0 and S % block_kv == 0
    n_q = S // block_q
    n_kv = S // block_kv
    block_s = 256 if S % 256 == 0 else (128 if S % 128 == 0 else S)

    # Hoisted Q/K/V projections: computed once per (batch, head).
    q_p, k_p, v_p = _qkv_projection(
        query.astype(_BF16), key.astype(_BF16), value.astype(_BF16),
        wq_r, bq_r, wk_r, bk_r, wv_r, bv_r, block_s=block_s)

    out = pl.pallas_call(
        _flash_attn_kernel,
        out_shape=jax.ShapeDtypeStruct((B, S, D), out_dtype),
        grid=(B, n_q, h, n_kv),
        in_specs=[
            pl.BlockSpec((1, 1, block_q, d_k),
                         lambda b, qi, hi, ki: (b, hi, qi, 0)),
            pl.BlockSpec((1, 1, block_kv, d_k),
                         lambda b, qi, hi, ki: (b, hi, ki, 0)),
            pl.BlockSpec((1, 1, block_kv, d_k),
                         lambda b, qi, hi, ki: (b, hi, ki, 0)),
            pl.BlockSpec((1, d_k, D), lambda b, qi, hi, ki: (hi, 0, 0)),
            pl.BlockSpec((1, D), lambda b, qi, hi, ki: (0, 0)),
        ],
        out_specs=pl.BlockSpec((1, block_q, D),
                               lambda b, qi, hi, ki: (b, qi, 0)),
        scratch_shapes=[
            pltpu.VMEM((block_q, 1), _F32),     # running max
            pltpu.VMEM((block_q, 1), _F32),     # running denominator
            pltpu.VMEM((block_q, d_k), _F32),   # running numerator
            pltpu.VMEM((block_q, D), _F32),     # output-proj accumulator
        ],
        compiler_params=pltpu.CompilerParams(
            dimension_semantics=("parallel", "parallel", "arbitrary", "arbitrary"),
            vmem_limit_bytes=32 * 1024 * 1024),
    )(q_p, k_p, v_p, wo_r, bo_r)

    # torch.squeeze(outputs): drop all size-1 dims.
    return jnp.squeeze(out)


def multi_headed_attention(query, key, value, params, *, h, **kwargs):
    """Convenience wrapper (re-lays out the weights on every call)."""
    return mha_forward(query, key, value, prepare_params(params, h=h),
                       h=h, **kwargs)


def init_params(key, d_model):
    """4 x nn.Linear(d_model, d_model); weights xavier_normal_, default bias."""
    keys = jax.random.split(key, 8)
    std = math.sqrt(2.0 / (d_model + d_model))   # xavier normal, gain=1
    bbound = 1.0 / math.sqrt(d_model)            # PyTorch default bias init
    params = []
    for i in range(4):
        w = std * jax.random.normal(keys[2 * i], (d_model, d_model),
                                    dtype=jnp.float32)
        b = jax.random.uniform(keys[2 * i + 1], (d_model,), dtype=jnp.float32,
                               minval=-bbound, maxval=bbound)
        params.extend([w, b])
    return tuple(params)


def _reference(query, key, value, params, *, h):
    """Pure-JAX reference of the PyTorch forward (eval mode), same mixed
    precision as the kernels (bf16 matmul operands, f32 accumulation)."""
    B, S, D = query.shape
    d_k = D // h
    wq, bq, wk, bk, wv, bv, wo, bo = params
    bf = jnp.bfloat16

    def lin(x, w, b):
        y = lax.dot_general(x.astype(bf).reshape(B * S, D), w.astype(bf),
                            (((1,), (1,)), ((), ())),
                            preferred_element_type=jnp.float32)
        return (y + b).reshape(B, S, D)

    q = lin(query, wq, bq).reshape(B, S, h, d_k).transpose(0, 2, 1, 3)
    k = lin(key, wk, bk).reshape(B, S, h, d_k).transpose(0, 2, 1, 3)
    v = lin(value, wv, bv).reshape(B, S, h, d_k).transpose(0, 2, 1, 3)

    scores = jnp.einsum('bhqd,bhkd->bhqk', q.astype(bf), k.astype(bf),
                        preferred_element_type=jnp.float32) / math.sqrt(d_k)
    p = jax.nn.softmax(scores, axis=-1)
    x = jnp.einsum('bhqk,bhkd->bhqd', p.astype(bf), v.astype(bf),
                   preferred_element_type=jnp.float32)
    x = x.transpose(0, 2, 1, 3).reshape(B, S, D)
    out = lax.dot_general(x.astype(bf).reshape(B * S, D), wo.astype(bf),
                          (((1,), (1,)), ((), ())),
                          preferred_element_type=jnp.float32) + bo
    return jnp.squeeze(out.reshape(B, S, D))


if __name__ == "__main__":
    B, S, d_model, h = 2, 32, 128, 4

    root = jax.random.PRNGKey(0)
    kp, kq, kk, kv = jax.random.split(root, 4)

    params = init_params(kp, d_model)
    query = jax.random.normal(kq, (B, S, d_model), dtype=jnp.float32)
    key_ = jax.random.normal(kk, (B, S, d_model), dtype=jnp.float32)
    value = jax.random.normal(kv, (B, S, d_model), dtype=jnp.float32)

    # One-time weight re-layout (cached across forward calls).
    prepared = prepare_params(params, h=h)

    # Small blocks so the test exercises the full grid: n_q=2, h=4, n_kv=2
    # (online-softmax carry, per-head output accumulation, B*n_q=4 parallel).
    out = mha_forward(query, key_, value, prepared, h=h,
                      block_q=16, block_kv=16)
    out = jax.block_until_ready(out)

    ref = _reference(query, key_, value, params, h=h)
    assert out.shape == ref.shape, (out.shape, ref.shape)
    assert jnp.allclose(out, ref, atol=3e-2, rtol=3e-2), (
        "mismatch vs reference, max abs err = "
        f"{float(jnp.max(jnp.abs(out - ref)))}")

    print("KERNEL_OK")
</pallas_src>

<mosaic_0001>
module attributes {stable_mosaic.version = 11 : i64} {
  func.func @_qkv_proj_kernel(%arg0: i32, %arg1: i32, %arg2: i32, %arg3: memref<1x32x128xbf16, #tpu.memory_space<vmem>>, %arg4: memref<1x32x128xbf16, #tpu.memory_space<vmem>>, %arg5: memref<1x32x128xbf16, #tpu.memory_space<vmem>>, %arg6: memref<4x128x32xbf16, #tpu.memory_space<vmem>>, %arg7: memref<4x1x32xf32, #tpu.memory_space<vmem>>, %arg8: memref<4x128x32xbf16, #tpu.memory_space<vmem>>, %arg9: memref<4x1x32xf32, #tpu.memory_space<vmem>>, %arg10: memref<4x128x32xbf16, #tpu.memory_space<vmem>>, %arg11: memref<4x1x32xf32, #tpu.memory_space<vmem>>, %arg12: memref<1x1x32x32xbf16, #tpu.memory_space<vmem>>, %arg13: memref<1x1x32x32xbf16, #tpu.memory_space<vmem>>, %arg14: memref<1x1x32x32xbf16, #tpu.memory_space<vmem>>) attributes {dimension_semantics = [#tpu.dimension_semantics<parallel>, #tpu.dimension_semantics<parallel>, #tpu.dimension_semantics<arbitrary>], iteration_bounds = array<i64: 2, 1, 4>, scalar_prefetch = 0 : i64, scratch_operands = 0 : i64, tpu.core_type = #tpu.core_type<tc>, window_params = [{transform_indices = @transform_0, window_bounds = array<i64: 1, 32, 128>}, {transform_indices = @transform_1, window_bounds = array<i64: 1, 32, 128>}, {transform_indices = @transform_2, window_bounds = array<i64: 1, 32, 128>}, {pipeline_mode = #tpu.pipeline_mode<synchronous>, transform_indices = @transform_3, window_bounds = array<i64: 4, 128, 32>}, {pipeline_mode = #tpu.pipeline_mode<synchronous>, transform_indices = @transform_4, window_bounds = array<i64: 4, 1, 32>}, {pipeline_mode = #tpu.pipeline_mode<synchronous>, transform_indices = @transform_5, window_bounds = array<i64: 4, 128, 32>}, {pipeline_mode = #tpu.pipeline_mode<synchronous>, transform_indices = @transform_6, window_bounds = array<i64: 4, 1, 32>}, {pipeline_mode = #tpu.pipeline_mode<synchronous>, transform_indices = @transform_7, window_bounds = array<i64: 4, 128, 32>}, {pipeline_mode = #tpu.pipeline_mode<synchronous>, transform_indices = @transform_8, window_bounds = array<i64: 4, 1, 32>}, {transform_indices = @transform_9, window_bounds = array<i64: 1, 1, 32, 32>}, {transform_indices = @transform_10, window_bounds = array<i64: 1, 1, 32, 32>}, {transform_indices = @transform_11, window_bounds = array<i64: 1, 1, 32, 32>}]} {
    %c0 = arith.constant 0 : index
    %c0_0 = arith.constant 0 : index
    %c0_1 = arith.constant 0 : index
    %0 = vector.load %arg3[%c0, %c0_0, %c0_1] : memref<1x32x128xbf16, #tpu.memory_space<vmem>>, vector<1x32x128xbf16>
    %1 = vector.shape_cast %0 : vector<1x32x128xbf16> to vector<32x128xbf16>
    %2 = arith.index_cast %arg2 : i32 to index
    %c0_2 = arith.constant 0 : index
    %c0_3 = arith.constant 0 : index
    %3 = vector.load %arg6[%2, %c0_2, %c0_3] : memref<4x128x32xbf16, #tpu.memory_space<vmem>>, vector<1x128x32xbf16>
    %4 = vector.shape_cast %3 : vector<1x128x32xbf16> to vector<128x32xbf16>
    %cst = arith.constant dense<0.000000e+00> : vector<32x32xf32>
    %5 = tpu.matmul %1, %4, %cst {dimension_numbers = #tpu.dot_dimension_numbers<[1], [0], [0], [1], [0, 0, 1, 1], [], []>} : vector<32x128xbf16>, vector<128x32xbf16>, vector<32x32xf32> -> vector<32x32xf32>
    %6 = arith.index_cast %arg2 : i32 to index
    %c0_4 = arith.constant 0 : index
    %c0_5 = arith.constant 0 : index
    %7 = vector.load %arg7[%6, %c0_4, %c0_5] : memref<4x1x32xf32, #tpu.memory_space<vmem>>, vector<1x1x32xf32>
    %8 = vector.shape_cast %7 : vector<1x1x32xf32> to vector<1x32xf32>
    %9 = vector.broadcast %8 : vector<1x32xf32> to vector<32x32xf32>
    %10 = arith.addf %5, %9 : vector<32x32xf32>
    %11 = arith.truncf %10 : vector<32x32xf32> to vector<32x32xbf16>
    %c0_6 = arith.constant 0 : index
    %c0_7 = arith.constant 0 : index
    %c0_8 = arith.constant 0 : index
    %c0_9 = arith.constant 0 : index
    %12 = vector.load %arg12[%c0_6, %c0_7, %c0_8, %c0_9] : memref<1x1x32x32xbf16, #tpu.memory_space<vmem>>, vector<1x1x32x32xbf16>
    %13 = vector.shape_cast %12 : vector<1x1x32x32xbf16> to vector<32x32xbf16>
    %14 = vector.shape_cast %11 : vector<32x32xbf16> to vector<1x1x32x32xbf16>
    tpu.vector_store %arg12[%c0_6, %c0_7, %c0_8, %c0_9], %14 {strides = array<i32>} : memref<1x1x32x32xbf16, #tpu.memory_space<vmem>>, vector<1x1x32x32xbf16>,
    %c0_10 = arith.constant 0 : index
    %c0_11 = arith.constant 0 : index
    %c0_12 = arith.constant 0 : index
    %15 = vector.load %arg4[%c0_10, %c0_11, %c0_12] : memref<1x32x128xbf16, #tpu.memory_space<vmem>>, vector<1x32x128xbf16>
    %16 = vector.shape_cast %15 : vector<1x32x128xbf16> to vector<32x128xbf16>
    %17 = arith.index_cast %arg2 : i32 to index
    %c0_13 = arith.constant 0 : index
    %c0_14 = arith.constant 0 : index
    %18 = vector.load %arg8[%17, %c0_13, %c0_14] : memref<4x128x32xbf16, #tpu.memory_space<vmem>>, vector<1x128x32xbf16>
    %19 = vector.shape_cast %18 : vector<1x128x32xbf16> to vector<128x32xbf16>
    %cst_15 = arith.constant dense<0.000000e+00> : vector<32x32xf32>
    %20 = tpu.matmul %16, %19, %cst_15 {dimension_numbers = #tpu.dot_dimension_numbers<[1], [0], [0], [1], [0, 0, 1, 1], [], []>} : vector<32x128xbf16>, vector<128x32xbf16>, vector<32x32xf32> -> vector<32x32xf32>
    %21 = arith.index_cast %arg2 : i32 to index
    %c0_16 = arith.constant 0 : index
    %c0_17 = arith.constant 0 : index
    %22 = vector.load %arg9[%21, %c0_16, %c0_17] : memref<4x1x32xf32, #tpu.memory_space<vmem>>, vector<1x1x32xf32>
    %23 = vector.shape_cast %22 : vector<1x1x32xf32> to vector<1x32xf32>
    %24 = vector.broadcast %23 : vector<1x32xf32> to vector<32x32xf32>
    %25 = arith.addf %20, %24 : vector<32x32xf32>
    %26 = arith.truncf %25 : vector<32x32xf32> to vector<32x32xbf16>
    %c0_18 = arith.constant 0 : index
    %c0_19 = arith.constant 0 : index
    %c0_20 = arith.constant 0 : index
    %c0_21 = arith.constant 0 : index
    %27 = vector.load %arg13[%c0_18, %c0_19, %c0_20, %c0_21] : memref<1x1x32x32xbf16, #tpu.memory_space<vmem>>, vector<1x1x32x32xbf16>
    %28 = vector.shape_cast %27 : vector<1x1x32x32xbf16> to vector<32x32xbf16>
    %29 = vector.shape_cast %26 : vector<32x32xbf16> to vector<1x1x32x32xbf16>
    tpu.vector_store %arg13[%c0_18, %c0_19, %c0_20, %c0_21], %29 {strides = array<i32>} : memref<1x1x32x32xbf16, #tpu.memory_space<vmem>>, vector<1x1x32x32xbf16>,
    %c0_22 = arith.constant 0 : index
    %c0_23 = arith.constant 0 : index
    %c0_24 = arith.constant 0 : index
    %30 = vector.load %arg5[%c0_22, %c0_23, %c0_24] : memref<1x32x128xbf16, #tpu.memory_space<vmem>>, vector<1x32x128xbf16>
    %31 = vector.shape_cast %30 : vector<1x32x128xbf16> to vector<32x128xbf16>
    %32 = arith.index_cast %arg2 : i32 to index
    %c0_25 = arith.constant 0 : index
    %c0_26 = arith.constant 0 : index
    %33 = vector.load %arg10[%32, %c0_25, %c0_26] : memref<4x128x32xbf16, #tpu.memory_space<vmem>>, vector<1x128x32xbf16>
    %34 = vector.shape_cast %33 : vector<1x128x32xbf16> to vector<128x32xbf16>
    %cst_27 = arith.constant dense<0.000000e+00> : vector<32x32xf32>
    %35 = tpu.matmul %31, %34, %cst_27 {dimension_numbers = #tpu.dot_dimension_numbers<[1], [0], [0], [1], [0, 0, 1, 1], [], []>} : vector<32x128xbf16>, vector<128x32xbf16>, vector<32x32xf32> -> vector<32x32xf32>
    %36 = arith.index_cast %arg2 : i32 to index
    %c0_28 = arith.constant 0 : index
    %c0_29 = arith.constant 0 : index
    %37 = vector.load %arg11[%36, %c0_28, %c0_29] : memref<4x1x32xf32, #tpu.memory_space<vmem>>, vector<1x1x32xf32>
    %38 = vector.shape_cast %37 : vector<1x1x32xf32> to vector<1x32xf32>
    %39 = vector.broadcast %38 : vector<1x32xf32> to vector<32x32xf32>
    %40 = arith.addf %35, %39 : vector<32x32xf32>
    %41 = arith.truncf %40 : vector<32x32xf32> to vector<32x32xbf16>
    %c0_30 = arith.constant 0 : index
    %c0_31 = arith.constant 0 : index
    %c0_32 = arith.constant 0 : index
    %c0_33 = arith.constant 0 : index
    %42 = vector.load %arg14[%c0_30, %c0_31, %c0_32, %c0_33] : memref<1x1x32x32xbf16, #tpu.memory_space<vmem>>, vector<1x1x32x32xbf16>
    %43 = vector.shape_cast %42 : vector<1x1x32x32xbf16> to vector<32x32xbf16>
    %44 = vector.shape_cast %41 : vector<32x32xbf16> to vector<1x1x32x32xbf16>
    tpu.vector_store %arg14[%c0_30, %c0_31, %c0_32, %c0_33], %44 {strides = array<i32>} : memref<1x1x32x32xbf16, #tpu.memory_space<vmem>>, vector<1x1x32x32xbf16>,
    return
  }
  func.func @transform_0(%arg0: i32, %arg1: i32, %arg2: i32) -> (i32, i32, i32) {
    %c0_i32 = arith.constant 0 : i32
    %c0_i32_0 = arith.constant 0 : i32
    return %arg0, %arg1, %c0_i32 : i32, i32, i32
  }
  func.func @transform_1(%arg0: i32, %arg1: i32, %arg2: i32) -> (i32, i32, i32) {
    %c0_i32 = arith.constant 0 : i32
    %c0_i32_0 = arith.constant 0 : i32
    return %arg0, %arg1, %c0_i32 : i32, i32, i32
  }
  func.func @transform_2(%arg0: i32, %arg1: i32, %arg2: i32) -> (i32, i32, i32) {
    %c0_i32 = arith.constant 0 : i32
    %c0_i32_0 = arith.constant 0 : i32
    return %arg0, %arg1, %c0_i32 : i32, i32, i32
  }
  func.func @transform_3(%arg0: i32, %arg1: i32, %arg2: i32) -> (i32, i32, i32) {
    %c0_i32 = arith.constant 0 : i32
    %c0_i32_0 = arith.constant 0 : i32
    %c0_i32_1 = arith.constant 0 : i32
    %c0_i32_2 = arith.constant 0 : i32
    return %c0_i32, %c0_i32_0, %c0_i32_1 : i32, i32, i32
  }
  func.func @transform_4(%arg0: i32, %arg1: i32, %arg2: i32) -> (i32, i32, i32) {
    %c0_i32 = arith.constant 0 : i32
    %c0_i32_0 = arith.constant 0 : i32
    %c0_i32_1 = arith.constant 0 : i32
    %c0_i32_2 = arith.constant 0 : i32
    return %c0_i32, %c0_i32_0, %c0_i32_1 : i32, i32, i32
  }
  func.func @transform_5(%arg0: i32, %arg1: i32, %arg2: i32) -> (i32, i32, i32) {
    %c0_i32 = arith.constant 0 : i32
    %c0_i32_0 = arith.constant 0 : i32
    %c0_i32_1 = arith.constant 0 : i32
    %c0_i32_2 = arith.constant 0 : i32
    return %c0_i32, %c0_i32_0, %c0_i32_1 : i32, i32, i32
  }
  func.func @transform_6(%arg0: i32, %arg1: i32, %arg2: i32) -> (i32, i32, i32) {
    %c0_i32 = arith.constant 0 : i32
    %c0_i32_0 = arith.constant 0 : i32
    %c0_i32_1 = arith.constant 0 : i32
    %c0_i32_2 = arith.constant 0 : i32
    return %c0_i32, %c0_i32_0, %c0_i32_1 : i32, i32, i32
  }
  func.func @transform_7(%arg0: i32, %arg1: i32, %arg2: i32) -> (i32, i32, i32) {
    %c0_i32 = arith.constant 0 : i32
    %c0_i32_0 = arith.constant 0 : i32
    %c0_i32_1 = arith.constant 0 : i32
    %c0_i32_2 = arith.constant 0 : i32
    return %c0_i32, %c0_i32_0, %c0_i32_1 : i32, i32, i32
  }
  func.func @transform_8(%arg0: i32, %arg1: i32, %arg2: i32) -> (i32, i32, i32) {
    %c0_i32 = arith.constant 0 : i32
    %c0_i32_0 = arith.constant 0 : i32
    %c0_i32_1 = arith.constant 0 : i32
    %c0_i32_2 = arith.constant 0 : i32
    return %c0_i32, %c0_i32_0, %c0_i32_1 : i32, i32, i32
  }
  func.func @transform_9(%arg0: i32, %arg1: i32, %arg2: i32) -> (i32, i32, i32, i32) {
    %c0_i32 = arith.constant 0 : i32
    %c0_i32_0 = arith.constant 0 : i32
    return %arg0, %arg2, %arg1, %c0_i32 : i32, i32, i32, i32
  }
  func.func @transform_10(%arg0: i32, %arg1: i32, %arg2: i32) -> (i32, i32, i32, i32) {
    %c0_i32 = arith.constant 0 : i32
    %c0_i32_0 = arith.constant 0 : i32
    return %arg0, %arg2, %arg1, %c0_i32 : i32, i32, i32, i32
  }
  func.func @transform_11(%arg0: i32, %arg1: i32, %arg2: i32) -> (i32, i32, i32, i32) {
    %c0_i32 = arith.constant 0 : i32
    %c0_i32_0 = arith.constant 0 : i32
    return %arg0, %arg2, %arg1, %c0_i32 : i32, i32, i32, i32
  }
}

</mosaic_0001>

<bundles_post_ra>
// kernel: tpu_custom_call.1
= control target key start
LH: loop header
LB: loop body
LE: loop exit
PB: predicated region body
PF: predicated region fallthrough
CT: control target
= control target key end

     0   :  { %s2114_s0 = inlined_call_operand.vmem [shape: bf16[2,32,128], index: 0, kind: input, shape index: {}]   ;;  %s2115_s1 = inlined_call_operand.vmem [shape: bf16[2,32,128], index: 1, kind: input, shape index: {}]   ;;  %s2116_s2 = inlined_call_operand.vmem [shape: bf16[2,32,128], index: 2, kind: input, shape index: {}]   ;;  %s2117_s3 = inlined_call_operand.vmem [shape: bf16[4,128,32], index: 3, kind: input, shape index: {}]   ;;  %s2118_s4 = inlined_call_operand.vmem [shape: f32[4,1,32], index: 4, kind: input, shape index: {}]   ;;  %s2119_s5 = inlined_call_operand.vmem [shape: bf16[4,128,32], index: 5, kind: input, shape index: {}]   ;;  %s2120_s6 = inlined_call_operand.vmem [shape: f32[4,1,32], index: 6, kind: input, shape index: {}]   ;;  %s2121_s7 = inlined_call_operand.vmem [shape: bf16[4,128,32], index: 7, kind: input, shape index: {}]   ;;  %s2122_s8 = inlined_call_operand.vmem [shape: f32[4,1,32], index: 8, kind: input, shape index: {}]   ;;  %s2123_s9 = inlined_call_operand.hbm [shape: bf16[2,4,32,32], index: 9, kind: output, shape index: {0}]   ;;  %s2124_s10 = inlined_call_operand.hbm [shape: bf16[2,4,32,32], index: 10, kind: output, shape index: {1}]   ;;  %s2125_s11 = inlined_call_operand.hbm [shape: bf16[2,4,32,32], index: 11, kind: output, shape index: {2}]  }
   0x1   :  { %2136 = sst [smem:[#allocation12_spill]] %s2114_s0 }
   0x2   :  { %2137 = sst [smem:[#allocation13_spill]] %s2115_s1 }
   0x3   :  { %2138 = sst [smem:[#allocation14_spill]] %s2116_s2 }
   0x4   :  { %2139 = sst [smem:[#allocation15_spill]] %s2117_s3 }
   0x5   :  { %17 = vsyncpa [#allocation3], 0 }
   0x6   :  { %19 = vsyncpa [#allocation3 + $0x1], 0 }
   0x7   :  { %20 = vsyncpa [#allocation5], 0 }
   0x8   :  { %22 = vsyncpa [#allocation5 + $0x1], 0  ;;  %s1795_s17 = smov 0   ;;  %s1797_s18 = smov 0  }
   0x9   :  { %s1799_s19 = smov 0   ;;  %s1801_s20 = smov 0  }
   0xa   :  { %s1803_s21 = smov 0   ;;  %s1805_s22 = smov 0  }
   0xb   :  { %s1807_s23 = smov 0   ;;  %s1809_s24 = smov 0  }
   0xc LB: > { %2140 = sst [smem:[#allocation9_spill]] %s1720_s22  ;;  %s2127_s25 = sadd.s32 4294967295, %s1728_s24   ;;  %s1728_s24 = sphi %s1809_s24, %s28_s24   ;;  %s1724_s23 = sphi %s1807_s23, %s2163_s23   ;;  %s1720_s22 = sphi %s1805_s22, %s2157_s22   ;;  %s1716_s21 = sphi %s1803_s21, %s2162_s21   ;;  %s1712_s20 = sphi %s1801_s20, %s2156_s20   ;;  %s1708_s19 = sphi %s1799_s19, %s2161_s19   ;;  %s1704_s18 = sphi %s1797_s18, %s2160_s18   ;;  %s1700_s17 = sphi %s1795_s17, %s2159_s17  }
   0xd   : > { %s2126_s26 = sadd.s32 4294967294, %s1728_s24   ;;  %s40_s27 = sadd.s32 1, %s1720_s22 }
   0xe   : > { %p41_p0 = scmp.ge.s32.totalorder %s40_s27, 4  ;;  %s47_s28 = sadd.s32 1, %s1724_s23 }
   0xf   : > { %p278_p1 = scmp.ne.s32.totalorder %s1708_s19, %s1704_s18  ;;  %p279_p2 = scmp.eq.s32.totalorder %s2127_s25, 7 }
  0x10   : > { %s2165_s27 = smov (%p41_p0, %s40_s27), 0  ;;  %s2167_s28 = smov (!%p41_p0, %s47_s28), %s1724_s23 }
  0x11   : > { %2141 = sst [smem:[#allocation10_spill]] %s2165_s27  ;;  %s262_s29 = ssub.s32 %s1720_s22, %s2165_s27 }
  0x12   : > { %p1848_p3 = por %p279_p2, %p278_p1  ;;  %p49_p4 = scmp.ge.s32.totalorder %s2167_s28, 2 }
  0x13   : > { %p284_p5 = scmp.ne.s32.totalorder %s1704_s18, %s1700_s17  ;;  %p285_p6 = scmp.eq.s32.totalorder %s2126_s26, 7 }
  0x14   : > { %p1280_p7 = scmp.ge.s32.totalorder %s1728_s24, 1  ;;  %s2169_s28 = smov (%p49_p4, %s2167_s28), 0 }
  0x15   : > { %2143 = sst [smem:[#allocation11_spill]] %s2169_s28  ;;  %p1859_p8 = por %p285_p6, %p284_p5 }
  0x16   : > { %p420_p9 = scmp.lt.s32.totalorder %s1728_s24, 9  ;;  %s261_s13 = ssub.s32 %s1724_s23, %s2169_s28 }
  0x17   : > { %s268_s14 = sadd.s32 1, %s1708_s19  ;;  %s263_s15 = sor.u32 %s262_s29, %s261_s13 }
  0x18   : > { %p421_p10 = pnand %p1280_p7, %p420_p9  ;;  %p266_p11 = scmp.eq.s32.totalorder %s263_s15, 0 }
  0x19   : > { %s1356_s26 = sshll.u32 (!%p421_p10), %s1712_s20, 6  ;;  %p493_p12 = scmp.lt.s32.totalorder (!%p421_p10), %s1716_s21, 1  ;;  %vm682_vm0 = vcmask (!%p421_p10), 257024  }
  0x1a   : > { %s1868_s16 = scalar_select %p266_p11, %s1708_s19, %s268_s14  }
  0x1b   : > { %424 = sbr.rel (%p421_p10) target bundleno = 353 (0x161), region = 56  ;;  %s2145_s3 = sld [smem:[#allocation15_spill]] (!%p421_p10) }
  0x1c   : > { %s1886_s25 = scalar_lea.vmem (!%p421_p10), %s2119_s5, %s1356_s26  ;;  %s2146_s0 = sld [smem:[#allocation12_spill]] (!%p421_p10) }
  0x1d   : > { %v1552_v4 = vld [vmem:[%s1886_s25] sm:$0xff] (!%p421_p10)   ;;  %v1555_v6 = vld [vmem:[%s1886_s25 + $0x8] sm:$0xff] (!%p421_p10)   ;;  %s1901_s14 = scalar_lea.vmem (!%p421_p10), %s2121_s7, %s1356_s26  ;;  %v1557_v8 = vld [vmem:[%s1886_s25 + $0x10] sm:$0xff] (!%p421_p10)   ;;  %s2147_s1 = sld [smem:[#allocation13_spill]] (!%p421_p10) }
  0x1e   : > { %1421 = vmatprep.subr.bf16.mxu1 (!%p421_p10), %v1552_v4  ;;  %v1559_v10 = vld [vmem:[%s1886_s25 + $0x18] sm:$0xff] (!%p421_p10)   ;;  %v1561_v12 = vld [vmem:[%s1886_s25 + $0x20] sm:$0xff] (!%p421_p10)   ;;  %v1563_v14 = vld [vmem:[%s1886_s25 + $0x28] sm:$0xff] (!%p421_p10)   ;;  %s2148_s2 = sld [smem:[#allocation14_spill]] (!%p421_p10)  ;;  %s1342_s15 = sshll.u32 (!%p421_p10), %s1712_s20, 2 }
  0x1f   : > { %1422 = vmatpush3.bf16.msra.mxu1 (!%p421_p10), %v1552_v4  ;;  %v1556_v16 = vld [vmem:[%s1901_s14] sm:$0xff] (!%p421_p10)   ;;  %v1565_v17 = vld [vmem:[%s1886_s25 + $0x30] sm:$0xff] (!%p421_p10)   ;;  %v1558_v19 = vld [vmem:[%s1901_s14 + $0x8] sm:$0xff] (!%p421_p10)  }
  0x20   : > { %1423 = vmatprep.subr.bf16.mxu1 (!%p421_p10), %v1555_v6  ;;  %v1567_v20 = vld [vmem:[%s1886_s25 + $0x38] sm:$0xff] (!%p421_p10)   ;;  %v1560_v22 = vld [vmem:[%s1901_s14 + $0x10] sm:$0xff] (!%p421_p10)   ;;  %v1564_v25 = vld [vmem:[%s1901_s14 + $0x20] sm:$0xff] (!%p421_p10)   ;;  %s549_s25 = scalar_lea.vmem (!%p421_p10), %s2118_s4, %s1712_s20 }
  0x21   : > { %s1875_s22 = scalar_lea.vmem (!%p421_p10), %s2145_s3, %s1356_s26  ;;  %v1562_v24 = vld [vmem:[%s1901_s14 + $0x18] sm:$0xff] (!%p421_p10)   ;;  %v1566_v26 = vld [vmem:[%s1901_s14 + $0x28] sm:$0xff] (!%p421_p10)   ;;  %v1568_v27 = vld [vmem:[%s1901_s14 + $0x30] sm:$0xff] (!%p421_p10)  }
  0x22   : > { %v1544_v0 = vld [vmem:[%s1875_s22] sm:$0xff]   ;;  %s494_s29 = scalar_select %p493_p12, %s1716_s21, 1  ;;  %v1545_v1 = vld [vmem:[%s1875_s22 + $0x8] sm:$0xff]   ;;  %v1546_v2 = vld [vmem:[%s1875_s22 + $0x10] sm:$0xff]  }
  0x23   : > { %1401 = vmatprep.subr.bf16.mxu0 %v1544_v0  ;;  %v1547_v3 = vld [vmem:[%s1875_s22 + $0x18] sm:$0xff]   ;;  %v1548_v7 = vld [vmem:[%s1875_s22 + $0x20] sm:$0xff]   ;;  %v1549_v9 = vld [vmem:[%s1875_s22 + $0x28] sm:$0xff]   ;;  %1424 = vmatpush3.bf16.msra.mxu1 %v1555_v6 }
  0x24   : > { %1402 = vmatpush3.bf16.msra.mxu0 %v1544_v0  ;;  %s1880_s13 = sshll.u32 %s494_s29, 4  ;;  %1425 = vmatprep.subr.bf16.mxu1 %v1557_v8  ;;  %v1550_v11 = vld [vmem:[%s1875_s22 + $0x30] sm:$0xff]   ;;  %v1551_v13 = vld [vmem:[%s1875_s22 + $0x38] sm:$0xff]   ;;  %s2131_s22 = sand.u32 1, %s1704_s18   ;;  %v1292_v30 = vld [vmem:[%s549_s25] ss:$0 sm:$0xff] }
  0x25   : > { %1403 = vmatprep.subr.bf16.mxu0 %v1545_v1  ;;  %s1892_s28 = scalar_lea.vmem %s2146_s0, %s1880_s13  ;;  %s1913_s27 = scalar_lea.vmem %s2147_s1, %s1880_s13  ;;  %v1571_v28 = vld [vmem:[%s1901_s14 + $0x38] sm:$0xff]  }
  0x26   : > { %v1553_v5 = vld [vmem:[%s1892_s28] sm:$0xff]   ;;  %s1923_s26 = scalar_lea.vmem %s2148_s2, %s1880_s13  ;;  %v1554_v18 = vld [vmem:[%s1892_s28 + $0x8] sm:$0xff]   ;;  %s1947_s29 = sshll.u32 %s2131_s22, 4 }
  0x27   : > { %1417 = vmatprep.mubr.bf16.mxu0 %v1553_v5  ;;  %1426 = vmatpush3.bf16.msra.mxu1 %v1557_v8  ;;  %v1569_v15 = vld [vmem:[%s1913_s27] sm:$0xff]   ;;  %v1570_v23 = vld [vmem:[%s1913_s27 + $0x8] sm:$0xff]   ;;  %s1343_s27 = sshll.u32 %s1716_s21, 4  ;;  %s477_s3 = scalar_lea.vmem [#allocation2], %s1947_s29 }
  0x28   : > { %1404 = vmatpush3.bf16.msra.mxu0 %v1545_v1  ;;  %1427 = vmatprep.subr.bf16.mxu1 %v1559_v10  ;;  %v1572_v21 = vld [vmem:[%s1923_s26] sm:$0xff]   ;;  %v1573_v29 = vld [vmem:[%s1923_s26 + $0x8] sm:$0xff]   ;;  %s1030_s14 = sadd.s32 %s1343_s27, %s1342_s15  ;;  %s1033_s26 = sshll.u32 %s477_s3, 4  ;;  %s1957_s26 = int_to_ptr.vmem [resolvable:$true] %s1033_s26 }
  0x29   : > { %1405 = vmatprep.subr.bf16.mxu0 %v1546_v2  ;;  %1437 = vmatprep.mubr.bf16.mxu1 %v1569_v15  ;;  %s709_s21 = scalar_lea.vmem %s2120_s6, %s1712_s20  ;;  %s1954_s22 = sshll.u32 %s1030_s14, 6 }
  0x2a   : > { %v1308_v43 = vld [vmem:[%s709_s21] ss:$0 sm:$0xff]  ;;  %s1964_s27 = scalar_lea.hbm %s2123_s9, %s1954_s22  ;;  %s2149_s14 = sand.u32 1, %s1704_s18  }
  0x2b   : > { %1428 = vmatpush3.bf16.msra.mxu1 %v1559_v10  ;;  %s1970_s28 = scalar_lea.sflag [#allocation3], %s2149_s14  ;;  %s1574_s13 = scalar_lea.vmem %s1957_s26, 256 }
  0x2c   : > { %1406 = vmatpush3.bf16.msra.mxu0 %v1546_v2  ;;  %1429 = vmatprep.subr.bf16.mxu1 %v1561_v12  ;;  %p1575_p13 = scmp.ne.s32.totalorder %s1957_s26, %s1574_s13  ;;  %s1730_s21 = smov [#allocation2]  }
  0x2d   : > { %1407 = vmatprep.subr.bf16.mxu0 %v1547_v3  ;;  %s1578_s25 = sshll.u32 %s1730_s21, 4  ;;  %s1579_s25 = int_to_ptr.vmem [resolvable:$false] %s1578_s25 }
  0x2e   : > { %p1576_p0 = pnand %p1575_p13, %p1848_p3  ;;  %s1580_s15 = scalar_lea.vmem %s1579_s25, 512 }
  0x2f   : > { %1430 = vmatpush3.bf16.msra.mxu1 %v1561_v12  ;;  %p1581_p2 = scmp.lt.s32.totalorder %s1957_s26, %s1579_s25  ;;  %p1582_p4 = scmp.lt.s32.totalorder %s1580_s15, %s1574_s13 }
  0x30   : > { %1408 = vmatpush3.bf16.msra.mxu0 %v1547_v3  ;;  %1431 = vmatprep.subr.bf16.mxu1 %v1563_v14  ;;  %p1577_p1 = pneg %p1576_p0 }
  0x31   : > { %1409 = vmatprep.subr.bf16.mxu0 %v1548_v7  ;;  %p1583_p5 = por %p1582_p4, %p1581_p2 }
  0x33   : > { %1432 = vmatpush3.bf16.msra.mxu1 %v1563_v14  ;;  %p1584_p6 = pnand %p1583_p5, %p1577_p1 }
  0x34   : > { %1410 = vmatpush3.bf16.msra.mxu0 %v1548_v7  ;;  %1433 = vmatprep.subr.bf16.mxu1 %v1565_v17 }
  0x35   : > { %1411 = vmatprep.subr.bf16.mxu0 %v1549_v9 }
  0x37   : > { %1434 = vmatpush3.bf16.msra.mxu1 %v1565_v17 }
  0x38   : > { %1412 = vmatpush3.bf16.msra.mxu0 %v1549_v9  ;;  %1435 = vmatprep.subr.bf16.mxu1 %v1567_v20 }
  0x39   : > { %1413 = vmatprep.subr.bf16.mxu0 %v1550_v11 }
  0x3b   : > { %1436 = vmatpush3.bf16.msra.mxu1 %v1567_v20 }
  0x3c   : > { %1414 = vmatpush3.bf16.msra.mxu0 %v1550_v11 }
  0x3d   : > { %1415 = vmatprep.subr.bf16.mxu0 %v1551_v13 }
  0x3e   : > { %1438 = vmatmul.mubr.bf16.vlgmr.msra.gmra.mrb[0].mxu1 %v1570_v23 }
  0x40   : > { %1416 = vmatpush3.bf16.msra.mxu0 %v1551_v13 }
  0x41   : > { %1441 = vmatprep.subr.bf16.mxu0 %v1556_v16 }
  0x43   : > { %1418 = vmatmul.mubr.bf16.vlgmr.msra.gmra.mrb[0].mxu0 %v1554_v18 }
  0x44   : > { %1442 = vmatpush3.bf16.msra.mxu0 %v1556_v16  ;;  %1457 = vmatprep.mubr.bf16.mxu0 %v1572_v21 }
  0x45   : > { %1443 = vmatprep.subr.bf16.mxu0 %v1558_v19 }
  0x48   : > { %1444 = vmatpush3.bf16.msra.mxu0 %v1558_v19 }
  0x49   : > { %1445 = vmatprep.subr.bf16.mxu0 %v1560_v22 }
  0x4c   : > { %1446 = vmatpush3.bf16.msra.mxu0 %v1560_v22 }
  0x4d   : > { %1447 = vmatprep.subr.bf16.mxu0 %v1562_v24 }
  0x50   : > { %1448 = vmatpush3.bf16.msra.mxu0 %v1562_v24 }
  0x51   : > { %1449 = vmatprep.subr.bf16.mxu0 %v1564_v25 }
  0x54   : > { %1450 = vmatpush3.bf16.msra.mxu0 %v1564_v25 }
  0x55   : > { %1451 = vmatprep.subr.bf16.mxu0 %v1566_v26 }
  0x58   : > { %1452 = vmatpush3.bf16.msra.mxu0 %v1566_v26 }
  0x59   : > { %1453 = vmatprep.subr.bf16.mxu0 %v1568_v27 }
  0x5c   : > { %1454 = vmatpush3.bf16.msra.mxu0 %v1568_v27 }
  0x5d   : > { %1455 = vmatprep.subr.bf16.mxu0 %v1571_v28 }
  0x60   : > { %1456 = vmatpush3.bf16.msra.mxu0 %v1571_v28 }
  0x63   : > { %1458 = vmatmul.mubr.bf16.vlgmr.msra.gmra.mrb[4].mxu0 %v1573_v29 }
 0x111   : > { %v1439_v44 = vpop.f32.mrb[0].mxu1 }
 0x112   : > { %v820_v45 = vadd.f32 %v1439_v44, %v1308_v43  ;;  %v811_v46 = vpop.f32.mrb[1].mxu1 }
 0x116   : > { %v1419_v31 = vpop.f32.mrb[0].mxu0 }
 0x117   : > { %v660_v32 = vadd.f32 %v1419_v31, %v1292_v30  ;;  %v651_v33 = vpop.f32.mrb[1].mxu0 }
 0x118   : > { %v652_v34 = vadd.f32 %v1292_v30, %v651_v33  ;;  %v1420_v35 = vpop.f32.mrb[2].mxu0 }
 0x119   : > { %v1359_v36 = vpack.c.bf16 %v660_v32, %v660_v32  ;;  %v663_v37 = vadd.f32 %v1420_v35, %v1292_v30  ;;  %v654_v38 = vpop.f32.mrb[3].mxu0 }
 0x11a   : > { %v1357_v39 = vpack.c.bf16 %v652_v34, %v652_v34  ;;  %v655_v40 = vadd.f32 %v1292_v30, %v654_v38 }
 0x11b   : > { %685 = vst.msk [vmem:[%s477_s3 + $0x8] sm:$0xf] %vm682_vm0, %v1359_v36  ;;  %v1360_v41 = vpack.c.bf16 %v663_v37, %v663_v37 }
 0x11c   : > { %683 = vst.msk [vmem:[%s477_s3] sm:$0xf] %vm682_vm0, %v1357_v39  ;;  %v1358_v42 = vpack.c.bf16 %v655_v40, %v655_v40 }
 0x11d   : > { %686 = vst.msk [vmem:[%s477_s3 + $0xc] sm:$0xf] %vm682_vm0, %v1360_v41 }
 0x11e   : > { %684 = vst.msk [vmem:[%s477_s3 + $0x4] sm:$0xf] %vm682_vm0, %v1358_v42 }
 0x11f   : > { %1587 = shalt.err (!%p1584_p6)
}
 0x120   : > { %s1588_s3 = scalar_lea.hbm %s1964_s27, 256  ;;  %s1592_s21 = scalar_lea.hbm %s2123_s9, 2048 }
 0x121   : > { %p1589_p7 = scmp.ne.s32.totalorder %s1964_s27, %s1588_s3  ;;  %p1593_p11 = scmp.lt.u32.totalorder %s1964_s27, %s2123_s9 }
 0x122   : > { %p1594_p12 = scmp.lt.u32.totalorder %s1592_s21, %s1588_s3  ;;  %p1596_p0 = scmp.lt.u32.totalorder %s1588_s3, %s1964_s27 }
 0x123   : > { %p1590_p9 = pnand %p1589_p7, %p1848_p3 }
 0x124   : > { %p1595_p13 = por %p1594_p12, %p1593_p11 }
 0x125   : > { %p1591_p10 = pneg %p1590_p9 }
 0x126   : > { %p1597_p1 = por %p1596_p0, %p1595_p13 }
 0x128   : > { %p1598_p2 = pnand %p1597_p1, %p1591_p10 }
 0x12a   : > { %1601 = shalt.err (!%p1598_p2)
}
 0x12b   : > { %s2132_s13 = smov 64   ;;  %s2134_s15 = smov 4   ;;  %v812_v47 = vadd.f32 %v1308_v43, %v811_v46  ;;  %v1440_v48 = vpop.f32.mrb[2].mxu1  ;;  %v1364_v49 = vpack.c.bf16 %v820_v45, %v820_v45 }
 0x12c   : > { %1461 = dma.vmem_to_hbm [thread:$0]  (%p1848_p3), %s1957_s26, 256, %s1964_s27, %s1970_s28, %s2132_s13, %s2132_s13, %s2134_s15   ;;  %v823_v50 = vadd.f32 %v1440_v48, %v1308_v43  ;;  %v814_v51 = vpop.f32.mrb[3].mxu1 }
 0x12d   : > { %s484_s0 = scalar_lea.vmem [#allocation4], %s1947_s29  ;;  %s2150_s3 = sadd.s32 4294967295, %s1728_s24   ;;  %v1362_v52 = vpack.c.bf16 %v812_v47, %v812_v47  ;;  %v815_v53 = vadd.f32 %v1308_v43, %v814_v51 }
 0x12e   : > { %s1053_s1 = sshll.u32 %s484_s0, 4  ;;  %s2000_s14 = sand.u32 1, %s2150_s3   ;;  %844 = vst.msk [vmem:[%s484_s0 + $0x8] sm:$0xf] %vm682_vm0, %v1364_v49  ;;  %v1365_v54 = vpack.c.bf16 %v823_v50, %v823_v50  ;;  %s2003_s1 = int_to_ptr.vmem [resolvable:$true] %s1053_s1 }
 0x12f   : > { %842 = vst.msk [vmem:[%s484_s0] sm:$0xf] %vm682_vm0, %v1362_v52  ;;  %v1363_v55 = vpack.c.bf16 %v815_v53, %v815_v53  ;;  %s2010_s28 = scalar_lea.hbm %s2124_s10, %s1954_s22  ;;  %s1602_s25 = scalar_lea.vmem %s2003_s1, 256 }
 0x130   : > { %845 = vst.msk [vmem:[%s484_s0 + $0xc] sm:$0xf] %vm682_vm0, %v1365_v54  ;;  %p1603_p4 = scmp.ne.s32.totalorder %s2003_s1, %s1602_s25  ;;  %s1733_s3 = smov [#allocation4]  }
 0x131   : > { %843 = vst.msk [vmem:[%s484_s0 + $0x4] sm:$0xf] %vm682_vm0, %v1363_v55  ;;  %s1606_s13 = sshll.u32 %s1733_s3, 4  ;;  %s1607_s13 = int_to_ptr.vmem [resolvable:$false] %s1606_s13 }
 0x132   : > { %p1604_p5 = pnand %p1603_p4, %p1848_p3  ;;  %s1608_s15 = scalar_lea.vmem %s1607_s13, 512 }
 0x133   : > { %p1609_p7 = scmp.lt.s32.totalorder %s2003_s1, %s1607_s13  ;;  %p1610_p9 = scmp.lt.s32.totalorder %s1608_s15, %s1602_s25 }
 0x134   : > { %p1605_p6 = pneg %p1604_p5 }
 0x135   : > { %p1611_p10 = por %p1610_p9, %p1609_p7 }
 0x137   : > { %p1612_p11 = pnand %p1611_p10, %p1605_p6 }
 0x139   : > { %1615 = shalt.err (!%p1612_p11)
}
 0x13a   : > { %s1616_s0 = scalar_lea.hbm %s2010_s28, 256  ;;  %s1620_s3 = scalar_lea.hbm %s2124_s10, 2048 }
 0x13b   : > { %p1617_p12 = scmp.ne.s32.totalorder %s2010_s28, %s1616_s0  ;;  %p1621_p1 = scmp.lt.u32.totalorder %s2010_s28, %s2124_s10 }
 0x13c   : > { %p1622_p2 = scmp.lt.u32.totalorder %s1620_s3, %s1616_s0  ;;  %p1624_p5 = scmp.lt.u32.totalorder %s1616_s0, %s2010_s28 }
 0x13d   : > { %p1618_p13 = pnand %p1617_p12, %p1848_p3 }
 0x13e   : > { %p1623_p4 = por %p1622_p2, %p1621_p1 }
 0x13f   : > { %p1619_p0 = pneg %p1618_p13 }
 0x140   : > { %p1625_p6 = por %p1624_p5, %p1623_p4 }
 0x142   : > { %p1626_p7 = pnand %p1625_p6, %p1619_p0 }
 0x144   : > { %1629 = shalt.err (!%p1626_p7)
}
 0x145   : > { %s2151_s15 = smov 4   ;;  %s2152_s25 = smov 64   ;;  %v1459_v57 = vpop.f32.mrb[4].mxu0 }
 0x146   : > { %s2153_s2 = scalar_lea.sflag [#allocation5], %s2000_s14  ;;  %s868_s27 = scalar_lea.vmem %s2122_s8, %s1712_s20  ;;  %v970_v59 = vpop.f32.mrb[5].mxu0 }
 0x147   : > { %1462 = dma.vmem_to_hbm [thread:$0]  (%p1848_p3), %s2003_s1, 256, %s2010_s28, %s2153_s2, %s2152_s25, %s2152_s25, %s2151_s15   ;;  %v1460_v61 = vpop.f32.mrb[6].mxu0 }
 0x148   : > { %v1324_v56 = vld [vmem:[%s868_s27] ss:$0 sm:$0xff]  ;;  %s491_s0 = scalar_lea.vmem [#allocation6], %s1947_s29  ;;  %v973_v0 = vpop.f32.mrb[7].mxu0  ;;  %s2054_s29 = scalar_lea.hbm %s2125_s11, %s1954_s22 }
 0x149   : > { %v979_v58 = vadd.f32 %v1459_v57, %v1324_v56  ;;  %v971_v60 = vadd.f32 %v1324_v56, %v970_v59  ;;  %s1073_s3 = sshll.u32 %s491_s0, 4  ;;  %v982_v63 = vadd.f32 %v1460_v61, %v1324_v56  ;;  %v974_v2 = vadd.f32 %v1324_v56, %v973_v0  ;;  %s1734_s28 = smov [#allocation6]   ;;  %s2047_s3 = int_to_ptr.vmem [resolvable:$true] %s1073_s3 }
 0x14a   : > { %s1630_s1 = scalar_lea.vmem %s2047_s3, 256  ;;  %s1634_s13 = sshll.u32 %s1734_s28, 4  ;;  %s1635_s13 = int_to_ptr.vmem [resolvable:$false] %s1634_s13 }
 0x14b   : > { %v1369_v62 = vpack.c.bf16 %v979_v58, %v979_v58  ;;  %v1367_v1 = vpack.c.bf16 %v971_v60, %v971_v60  ;;  %v1370_v3 = vpack.c.bf16 %v982_v63, %v982_v63  ;;  %v1368_v4 = vpack.c.bf16 %v974_v2, %v974_v2  ;;  %p1631_p9 = scmp.ne.s32.totalorder %s2047_s3, %s1630_s1  ;;  %s1636_s21 = scalar_lea.vmem %s1635_s13, 512 }
 0x14c   : > { %p1637_p12 = scmp.lt.s32.totalorder %s2047_s3, %s1635_s13  ;;  %p1638_p13 = scmp.lt.s32.totalorder %s1636_s21, %s1630_s1 }
 0x14d   : > { %1003 = vst.msk [vmem:[%s491_s0 + $0x8] sm:$0xf] %vm682_vm0, %v1369_v62  ;;  %1001 = vst.msk [vmem:[%s491_s0] sm:$0xf] %vm682_vm0, %v1367_v1  ;;  %p1632_p10 = pnand %p1631_p9, %p1848_p3 }
 0x14e   : > { %1004 = vst.msk [vmem:[%s491_s0 + $0xc] sm:$0xf] %vm682_vm0, %v1370_v3  ;;  %1002 = vst.msk [vmem:[%s491_s0 + $0x4] sm:$0xf] %vm682_vm0, %v1368_v4  ;;  %p1639_p0 = por %p1638_p13, %p1637_p12 }
 0x14f   : > { %p1633_p11 = pneg %p1632_p10 }
 0x151   : > { %p1640_p1 = pnand %p1639_p0, %p1633_p11 }
 0x153   : > { %1643 = shalt.err (!%p1640_p1)
}
 0x154   : > { %s1644_s22 = scalar_lea.hbm %s2054_s29, 256  ;;  %s1648_s0 = scalar_lea.hbm %s2125_s11, 2048 }
 0x155   : > { %p1645_p2 = scmp.ne.s32.totalorder %s2054_s29, %s1644_s22  ;;  %p1649_p6 = scmp.lt.u32.totalorder %s2054_s29, %s2125_s11 }
 0x156   : > { %p1650_p7 = scmp.lt.u32.totalorder %s1648_s0, %s1644_s22  ;;  %p1652_p10 = scmp.lt.u32.totalorder %s1644_s22, %s2054_s29 }
 0x157   : > { %p1646_p4 = pnand %p1645_p2, %p1848_p3 }
 0x158   : > { %p1651_p9 = por %p1650_p7, %p1649_p6 }
 0x159   : > { %p1647_p5 = pneg %p1646_p4 }
 0x15a   : > { %p1653_p11 = por %p1652_p10, %p1651_p9 }
 0x15c   : > { %p1654_p12 = pnand %p1653_p11, %p1647_p5 }
 0x15e   : > { %1657 = shalt.err (!%p1654_p12)
}
 0x15f   : > { %s2154_s1 = scalar_lea.sflag [#allocation5], %s2000_s14 }
 0x160   : > { %1463 = dma.vmem_to_hbm [thread:$0]  (%p1848_p3), %s2047_s3, 256, %s2054_s29, %s2154_s1, %s2152_s25, %s2152_s25, %s2151_s15  }
 0x161 PF: > { %p1477_p13 = scmp.ge.s32.totalorder %s1728_s24, 2  ;;  %s1088_s28 = sand.u32 1, %s1700_s17  }
 0x162   : > { %s1089_s13 = scalar_lea.sflag [#allocation3], %s1088_s28 }
 0x163   : > { %p1468_p0 = pnand %p1477_p13, %p1859_p8 }
 0x165   : > { %1691 = dma.done.wait (!%p1468_p0), %s1089_s13, 256  }
 0x166   : > { %1693 = vsyncadd (!%p1468_p0), %s1089_s13, 4294967040  ;;  %s2155_s30 = sadd.s32 4294967294, %s1728_s24  }
 0x167   : > { %s1097_s21 = sand.u32 1, %s2155_s30  }
 0x168   : > { %s1098_s22 = scalar_lea.sflag [#allocation5], %s1097_s21 }
 0x169   : > { %1695 = dma.done.wait (!%p1468_p0), %s1098_s22, 512  }
 0x16a   : > { %1697 = vsyncadd (!%p1468_p0), %s1098_s22, 4294966784  ;;  %s28_s24 = sadd.s32 1, %s1728_s24   ;;  %s2156_s20 = sld [smem:[#allocation9_spill]] }
 0x16b   : > { %p25_p3 = scmp.ge.s32.totalorder %s28_s24, 10   ;;  %s2157_s22 = sld [smem:[#allocation10_spill]] }
 0x16c   : > { %s2158_s12 = sld [smem:[#allocation11_spill]]  ;;  %s2159_s17 = smov %s1704_s18 }
 0x16d   : > { %s2160_s18 = smov %s1708_s19  ;;  %s2161_s19 = smov %s1868_s16 }
 0x16e   : > { %s2162_s21 = smov %s1724_s23  ;;  %27 = sbr.rel (!%p25_p3) target bundleno = 12 (0xc), region = 135 }
 0x172   : > { %s2163_s23 = smov %s2158_s12 }
 0x175   :  { %1112 = vsyncpa [#allocation3], 1 }
 0x176   :  { %1114 = vsyncpa [#allocation3 + $0x1], 1 }
 0x177   :  { %1115 = vsyncpa [#allocation5], 1 }
 0x178   :  { %1117 = vsyncpa [#allocation5 + $0x1], 1 }

</bundles_post_ra>
